<compile_context>
chip_gen: v6e
topology: v6e:2x2x1
jax: 0.10.0
libtpu: 0.0.40
codegen_flags: <defaults>
</compile_context>

<pallas_src>
import functools

import jax
import jax.numpy as jnp
from jax.experimental import pallas as pl
from jax.experimental.pallas import tpu as pltpu


def _round_up(v, mult):
    return (v + mult - 1) // mult * mult


def _amsoftmax_kernel(x_ref, w_ref, scale_ref, lab_ref,      # inputs
                      loss_ref, corr_ref,                    # outputs
                      xn_sc, m_sc, l_sc, tgt_sc, bv_sc, bi_sc,  # scratch
                      *, m, s, n_class, mask_classes):
    c = pl.program_id(1)
    nc = pl.num_programs(1)

    Bt = x_ref.shape[0]
    Ct = w_ref.shape[1]
    smm = float(s) * float(m)

    # --- per-batch-tile init: normalize x once, reset running stats ----------
    @pl.when(c == 0)
    def _init():
        x = x_ref[...].astype(jnp.float32)                       # (Bt, E)
        # clamp(sumsq, 1e-24) == clamp(norm, 1e-12); rsqrt+mul uses the EUP slot
        inv_x = jax.lax.rsqrt(
            jnp.maximum(jnp.sum(x * x, axis=1, keepdims=True), 1e-24))
        xn_sc[...] = (x * inv_x).astype(xn_sc.dtype)             # bf16 for MXU
        m_sc[...] = jnp.full(m_sc.shape, -jnp.inf, jnp.float32)
        l_sc[...] = jnp.zeros(l_sc.shape, jnp.float32)
        tgt_sc[...] = jnp.zeros(tgt_sc.shape, jnp.float32)
        bv_sc[...] = jnp.full(bv_sc.shape, -jnp.inf, jnp.float32)
        bi_sc[...] = jnp.zeros(bi_sc.shape, jnp.int32)

    lab = lab_ref[...]                                           # (Bt, 1) int32

    # --- cosine * s for this class tile (bf16 MXU, fp32 accumulate) ----------
    dot = jnp.dot(xn_sc[...], w_ref[...],
                  preferred_element_type=jnp.float32)            # (Bt, Ct)
    logits = dot * scale_ref[...]                                # * s/||w_col||

    # --- additive margin fused at the label lane ------------------------------
    col = jax.lax.broadcasted_iota(jnp.int32, (Bt, Ct), 1) + c * Ct
    onehot = col == lab                                          # (Bt, Ct) bool
    logits = jnp.where(onehot, logits - smm, logits)
    if mask_classes:  # static flag: only compiled when C was padded
        logits = jnp.where(col < n_class, logits, -jnp.inf)

    # --- running target logit (each label falls in exactly one class tile) ---
    tgt_sc[...] += jnp.sum(jnp.where(onehot, logits, 0.0), axis=1, keepdims=True)

    # --- online logsumexp ------------------------------------------------------
    m_tile = jnp.max(logits, axis=1, keepdims=True)              # (Bt, 1)
    m_new = jnp.maximum(m_sc[...], m_tile)
    l_sc[...] = (l_sc[...] * jnp.exp(m_sc[...] - m_new)
                 + jnp.sum(jnp.exp(logits - m_new), axis=1, keepdims=True))
    m_sc[...] = m_new

    # --- running top-1 (ties -> lowest class index, like torch.topk) ---------
    idx_tile = jnp.min(jnp.where(logits >= m_tile, col, n_class),
                       axis=1, keepdims=True)
    take_new = m_tile > bv_sc[...]          # strict: earlier tile wins on ties
    bv_sc[...] = jnp.where(take_new, m_tile, bv_sc[...])
    bi_sc[...] = jnp.where(take_new, idx_tile, bi_sc[...])

    # --- finalize: write per-sample loss / correctness once per batch tile ---
    @pl.when(c == nc - 1)
    def _finalize():
        loss_ref[...] = (m_sc[...] + jnp.log(l_sc[...])) - tgt_sc[...]
        corr_ref[...] = (bi_sc[...] == lab).astype(jnp.float32)


def am_softmax_forward(x, W, label, *, m, s,
                       b_tile=None, c_tile=None,
                       mxu_dtype=jnp.bfloat16,
                       w_buffers=None,
                       vmem_limit_bytes=64 * 1024 * 1024):
    """Returns (loss, prec1) exactly like AMSoftmax.forward.

    b_tile / c_tile: tile sizes; size them per generation (v7x has 64 MiB VMEM,
    so keep 2-3 * E * c_tile * 2B well under the limit).  w_buffers=3 deepens
    the W-stream pipeline when DMA is exposed and VMEM headroom allows.
    """
    B, E = x.shape
    E2, C = W.shape
    assert E == E2

    if b_tile is None:
        b_tile = min(128, _round_up(B, 8))
    if c_tile is None:
        c_tile = min(_round_up(C, 128), 2048)
    b_tile = _round_up(b_tile, 8)
    c_tile = _round_up(c_tile, 128)

    Bp = _round_up(B, b_tile)
    Cp = _round_up(C, c_tile)

    x32 = x.astype(jnp.float32)
    w32 = W.astype(jnp.float32)

    # s / ||w_col|| computed once in fp32 (B-independent) and streamed as a
    # (1, c_tile) row; cheaper than normalizing W element-wise in the kernel.
    scale = (s / jnp.maximum(
        jnp.sqrt(jnp.sum(w32 * w32, axis=0, keepdims=True)), 1e-12)
             ).astype(jnp.float32)                                 # (1, C)

    w_lo = w32.astype(mxu_dtype)                                   # bf16 stream
    if Cp != C:
        w_lo = jnp.pad(w_lo, ((0, 0), (0, Cp - C)))
        scale = jnp.pad(scale, ((0, 0), (0, Cp - C)))
    if Bp != B:
        x32 = jnp.pad(x32, ((0, Bp - B), (0, 0)))
        label = jnp.pad(label, (0, Bp - B))
    lab2d = label.reshape(Bp, 1).astype(jnp.int32)

    nb, nc = Bp // b_tile, Cp // c_tile

    w_spec_kwargs = {}
    if w_buffers is not None:
        w_spec_kwargs["pipeline_mode"] = pl.Buffered(w_buffers)

    kernel = functools.partial(_amsoftmax_kernel,
                               m=float(m), s=float(s),
                               n_class=int(C), mask_classes=(Cp != C))

    loss_rows, corr_rows = pl.pallas_call(
        kernel,
        out_shape=(
            jax.ShapeDtypeStruct((Bp, 1), jnp.float32),   # per-sample loss
            jax.ShapeDtypeStruct((Bp, 1), jnp.float32),   # per-sample correct
        ),
        grid_spec=pltpu.PrefetchScalarGridSpec(
            num_scalar_prefetch=0,
            grid=(nb, nc),
            in_specs=[
                pl.BlockSpec((b_tile, E), lambda b, c: (b, 0)),       # x
                pl.BlockSpec((E, c_tile), lambda b, c: (0, c),        # W stream
                             **w_spec_kwargs),
                pl.BlockSpec((1, c_tile), lambda b, c: (0, c)),       # s/||w||
                pl.BlockSpec((b_tile, 1), lambda b, c: (b, 0)),       # labels
            ],
            out_specs=(
                pl.BlockSpec((b_tile, 1), lambda b, c: (b, 0)),
                pl.BlockSpec((b_tile, 1), lambda b, c: (b, 0)),
            ),
            scratch_shapes=[
                pltpu.VMEM((b_tile, E), mxu_dtype),       # resident xn tile
                pltpu.VMEM((b_tile, 1), jnp.float32),     # running max
                pltpu.VMEM((b_tile, 1), jnp.float32),     # running sum(exp)
                pltpu.VMEM((b_tile, 1), jnp.float32),     # target logit
                pltpu.VMEM((b_tile, 1), jnp.float32),     # best value
                pltpu.VMEM((b_tile, 1), jnp.int32),       # best index
            ]),
        compiler_params=pltpu.CompilerParams(
            dimension_semantics=("parallel", "arbitrary"),
            vmem_limit_bytes=vmem_limit_bytes),
    )(x32, w_lo, scale, lab2d)

    # Tiny O(B) cross-batch-tile reduction (kept outside so the batch grid
    # axis can stay "parallel" for v7x megacore).
    loss = jnp.sum(loss_rows[:B, 0]) / B
    prec = jnp.sum(corr_rows[:B, 0]) * (100.0 / B)
    return loss, prec


# ----------------------------- references -----------------------------------
def _reference_fp32(x, W, label, m, s):
    xn = x / jnp.maximum(jnp.linalg.norm(x, axis=1, keepdims=True), 1e-12)
    wn = W / jnp.maximum(jnp.linalg.norm(W, axis=0, keepdims=True), 1e-12)
    costh = jnp.dot(xn, wn, precision="highest")
    logits = s * (costh - jax.nn.one_hot(label, W.shape[1], dtype=jnp.float32) * m)
    logp = jax.nn.log_softmax(logits, axis=1)
    loss = -jnp.mean(logp[jnp.arange(x.shape[0]), label])
    prec = jnp.mean((jnp.argmax(logits, axis=1) == label).astype(jnp.float32)) * 100.0
    return loss, prec


def _reference_bf16_matched(x, W, label, m, s):
    # Same math as the kernel's bf16-MXU path (bf16-rounded operands,
    # fp32 accumulation, scale-by-inv-norm after the matmul).
    inv_x = jax.lax.rsqrt(jnp.maximum(jnp.sum(x * x, axis=1, keepdims=True), 1e-24))
    xn = (x * inv_x).astype(jnp.bfloat16).astype(jnp.float32)
    scale = s / jnp.maximum(jnp.linalg.norm(W, axis=0, keepdims=True), 1e-12)
    d = jnp.dot(xn, W.astype(jnp.bfloat16).astype(jnp.float32), precision="highest")
    logits = d * scale - jax.nn.one_hot(label, W.shape[1], dtype=jnp.float32) * (s * m)
    logp = jax.nn.log_softmax(logits, axis=1)
    loss = -jnp.mean(logp[jnp.arange(x.shape[0]), label])
    prec = jnp.mean((jnp.argmax(logits, axis=1) == label).astype(jnp.float32)) * 100.0
    return loss, prec


if __name__ == "__main__":
    batch = 16
    embedding_size = 64
    n_class = 512
    m, s = 0.2, 30.0

    key = jax.random.PRNGKey(0)
    kx, kw, kl = jax.random.split(key, 3)

    # xavier_normal_(W, gain=1)
    std = (2.0 / (embedding_size + n_class)) ** 0.5
    W = jax.random.normal(kw, (embedding_size, n_class), dtype=jnp.float32) * std
    x = jax.random.normal(kx, (batch, embedding_size), dtype=jnp.float32)
    label = jax.random.randint(kl, (batch,), 0, n_class, dtype=jnp.int32)

    # Small tiles so the (2 batch-tile x 4 class-tile) grid exercises the
    # online cross-tile logsumexp / argmax and the cross-tile batch reduction.
    loss, prec1 = am_softmax_forward(x, W, label, m=m, s=s, b_tile=8, c_tile=128)
    jax.block_until_ready((loss, prec1))

    mref_loss, mref_prec = _reference_bf16_matched(x, W, label, m, s)
    ref_loss, ref_prec = _reference_fp32(x, W, label, m, s)

    # Tight check against a reference that uses the same bf16-rounded operands.
    assert jnp.allclose(loss, mref_loss, atol=5e-3, rtol=5e-3), (loss, mref_loss)
    assert jnp.allclose(prec1, mref_prec, atol=1e-3), (prec1, mref_prec)
    # Loose sanity check against the full-fp32 PyTorch-semantics reference
    # (bf16 MXU inputs at s=30 perturb the loss by O(1e-2)).
    assert jnp.allclose(loss, ref_loss, atol=0.25, rtol=0.02), (loss, ref_loss)

    print("KERNEL_OK")
</pallas_src>

<mosaic_0001>
module attributes {stable_mosaic.version = 11 : i64} {
  func.func @_amsoftmax_kernel(%arg0: i32, %arg1: i32, %arg2: memref<8x64xf32, #tpu.memory_space<vmem>>, %arg3: memref<64x128xbf16, #tpu.memory_space<vmem>>, %arg4: memref<1x128xf32, #tpu.memory_space<vmem>>, %arg5: memref<8x1xi32, #tpu.memory_space<vmem>>, %arg6: memref<8x1xf32, #tpu.memory_space<vmem>>, %arg7: memref<8x1xf32, #tpu.memory_space<vmem>>, %arg8: memref<8x64xbf16, #tpu.memory_space<vmem>>, %arg9: memref<8x1xf32, #tpu.memory_space<vmem>>, %arg10: memref<8x1xf32, #tpu.memory_space<vmem>>, %arg11: memref<8x1xf32, #tpu.memory_space<vmem>>, %arg12: memref<8x1xf32, #tpu.memory_space<vmem>>, %arg13: memref<8x1xi32, #tpu.memory_space<vmem>>) attributes {dimension_semantics = [#tpu.dimension_semantics<parallel>, #tpu.dimension_semantics<arbitrary>], iteration_bounds = array<i64: 2, 4>, scalar_prefetch = 0 : i64, scratch_operands = 6 : i64, tpu.core_type = #tpu.core_type<tc>, window_params = [{transform_indices = @transform_0, window_bounds = array<i64: 8, 64>}, {transform_indices = @transform_1, window_bounds = array<i64: 64, 128>}, {transform_indices = @transform_2, window_bounds = array<i64: 1, 128>}, {transform_indices = @transform_3, window_bounds = array<i64: 8, 1>}, {transform_indices = @transform_4, window_bounds = array<i64: 8, 1>}, {transform_indices = @transform_5, window_bounds = array<i64: 8, 1>}]} {
    %c0_i32 = arith.constant 0 : i32
    %0 = arith.cmpi eq, %arg1, %c0_i32 : i32
    %1 = arith.extui %0 : i1 to i32
    %c0_i32_0 = arith.constant 0 : i32
    %2 = arith.cmpi ne, %1, %c0_i32_0 : i32
    scf.if %2 {
      %c0_39 = arith.constant 0 : index
      %c0_40 = arith.constant 0 : index
      %60 = vector.load %arg2[%c0_39, %c0_40] : memref<8x64xf32, #tpu.memory_space<vmem>>, vector<8x64xf32>
      %61 = arith.mulf %60, %60 : vector<8x64xf32>
      %cst_41 = arith.constant dense<0.000000e+00> : vector<8xf32>
      %62 = vector.multi_reduction <add>, %61, %cst_41 [1] : vector<8x64xf32> to vector<8xf32>
      %63 = vector.shape_cast %62 : vector<8xf32> to vector<8x1xf32>
      %cst_42 = arith.constant 1.000000e-24 : f32
      %64 = vector.broadcast %cst_42 : f32 to vector<8x1xf32>
      %65 = arith.maximumf %63, %64 : vector<8x1xf32>
      %66 = math.rsqrt %65 : vector<8x1xf32>
      %67 = vector.broadcast %66 : vector<8x1xf32> to vector<8x64xf32>
      %68 = arith.mulf %60, %67 : vector<8x64xf32>
      %69 = arith.truncf %68 : vector<8x64xf32> to vector<8x64xbf16>
      %c0_43 = arith.constant 0 : index
      %c0_44 = arith.constant 0 : index
      %70 = vector.load %arg8[%c0_43, %c0_44] : memref<8x64xbf16, #tpu.memory_space<vmem>>, vector<8x64xbf16>
      tpu.vector_store %arg8[%c0_43, %c0_44], %69 {strides = array<i32>} : memref<8x64xbf16, #tpu.memory_space<vmem>>, vector<8x64xbf16>,
      %cst_45 = arith.constant 0xFF800000 : f32
      %71 = vector.broadcast %cst_45 : f32 to vector<8x1xf32>
      %c0_46 = arith.constant 0 : index
      %c0_47 = arith.constant 0 : index
      %72 = vector.load %arg9[%c0_46, %c0_47] : memref<8x1xf32, #tpu.memory_space<vmem>>, vector<8x1xf32>
      tpu.vector_store %arg9[%c0_46, %c0_47], %71 {strides = array<i32>} : memref<8x1xf32, #tpu.memory_space<vmem>>, vector<8x1xf32>,
      %cst_48 = arith.constant 0.000000e+00 : f32
      %73 = vector.broadcast %cst_48 : f32 to vector<8x1xf32>
      %c0_49 = arith.constant 0 : index
      %c0_50 = arith.constant 0 : index
      %74 = vector.load %arg10[%c0_49, %c0_50] : memref<8x1xf32, #tpu.memory_space<vmem>>, vector<8x1xf32>
      tpu.vector_store %arg10[%c0_49, %c0_50], %73 {strides = array<i32>} : memref<8x1xf32, #tpu.memory_space<vmem>>, vector<8x1xf32>,
      %cst_51 = arith.constant 0.000000e+00 : f32
      %75 = vector.broadcast %cst_51 : f32 to vector<8x1xf32>
      %c0_52 = arith.constant 0 : index
      %c0_53 = arith.constant 0 : index
      %76 = vector.load %arg11[%c0_52, %c0_53] : memref<8x1xf32, #tpu.memory_space<vmem>>, vector<8x1xf32>
      tpu.vector_store %arg11[%c0_52, %c0_53], %75 {strides = array<i32>} : memref<8x1xf32, #tpu.memory_space<vmem>>, vector<8x1xf32>,
      %cst_54 = arith.constant 0xFF800000 : f32
      %77 = vector.broadcast %cst_54 : f32 to vector<8x1xf32>
      %c0_55 = arith.constant 0 : index
      %c0_56 = arith.constant 0 : index
      %78 = vector.load %arg12[%c0_55, %c0_56] : memref<8x1xf32, #tpu.memory_space<vmem>>, vector<8x1xf32>
      tpu.vector_store %arg12[%c0_55, %c0_56], %77 {strides = array<i32>} : memref<8x1xf32, #tpu.memory_space<vmem>>, vector<8x1xf32>,
      %c0_i32_57 = arith.constant 0 : i32
      %79 = vector.broadcast %c0_i32_57 : i32 to vector<8x1xi32>
      %c0_58 = arith.constant 0 : index
      %c0_59 = arith.constant 0 : index
      %80 = vector.load %arg13[%c0_58, %c0_59] : memref<8x1xi32, #tpu.memory_space<vmem>>, vector<8x1xi32>
      tpu.vector_store %arg13[%c0_58, %c0_59], %79 {strides = array<i32>} : memref<8x1xi32, #tpu.memory_space<vmem>>, vector<8x1xi32>,
    } else {
    }
    %c0 = arith.constant 0 : index
    %c0_1 = arith.constant 0 : index
    %3 = vector.load %arg5[%c0, %c0_1] : memref<8x1xi32, #tpu.memory_space<vmem>>, vector<8x1xi32>
    %c0_2 = arith.constant 0 : index
    %c0_3 = arith.constant 0 : index
    %4 = vector.load %arg8[%c0_2, %c0_3] : memref<8x64xbf16, #tpu.memory_space<vmem>>, vector<8x64xbf16>
    %c0_4 = arith.constant 0 : index
    %c0_5 = arith.constant 0 : index
    %5 = vector.load %arg3[%c0_4, %c0_5] : memref<64x128xbf16, #tpu.memory_space<vmem>>, vector<64x128xbf16>
    %cst = arith.constant dense<0.000000e+00> : vector<8x128xf32>
    %6 = tpu.matmul %4, %5, %cst {dimension_numbers = #tpu.dot_dimension_numbers<[1], [0], [0], [1], [0, 0, 1, 1], [], []>} : vector<8x64xbf16>, vector<64x128xbf16>, vector<8x128xf32> -> vector<8x128xf32>
    %c0_6 = arith.constant 0 : index
    %c0_7 = arith.constant 0 : index
    %7 = vector.load %arg4[%c0_6, %c0_7] : memref<1x128xf32, #tpu.memory_space<vmem>>, vector<1x128xf32>
    %8 = vector.broadcast %7 : vector<1x128xf32> to vector<8x128xf32>
    %9 = arith.mulf %6, %8 : vector<8x128xf32>
    %10 = tpu.iota {dimensions = array<i32: 1>} : vector<8x128xi32>
    %c128_i32 = arith.constant 128 : i32
    %11 = arith.muli %arg1, %c128_i32 : i32
    %12 = vector.broadcast %11 : i32 to vector<8x128xi32>
    %13 = arith.addi %10, %12 : vector<8x128xi32>
    %14 = vector.broadcast %3 : vector<8x1xi32> to vector<8x128xi32>
    %15 = arith.cmpi eq, %13, %14 : vector<8x128xi32>
    %cst_8 = arith.constant 6.000000e+00 : f32
    %16 = vector.broadcast %cst_8 : f32 to vector<8x128xf32>
    %17 = arith.subf %9, %16 : vector<8x128xf32>
    %18 = arith.select %15, %17, %9 : vector<8x128xi1>, vector<8x128xf32>
    %c0_9 = arith.constant 0 : index
    %c0_10 = arith.constant 0 : index
    %19 = vector.load %arg11[%c0_9, %c0_10] : memref<8x1xf32, #tpu.memory_space<vmem>>, vector<8x1xf32>
    %cst_11 = arith.constant 0.000000e+00 : f32
    %20 = vector.broadcast %cst_11 : f32 to vector<8x128xf32>
    %21 = arith.select %15, %18, %20 : vector<8x128xi1>, vector<8x128xf32>
    %cst_12 = arith.constant dense<0.000000e+00> : vector<8xf32>
    %22 = vector.multi_reduction <add>, %21, %cst_12 [1] : vector<8x128xf32> to vector<8xf32>
    %23 = vector.shape_cast %22 : vector<8xf32> to vector<8x1xf32>
    %24 = arith.addf %19, %23 : vector<8x1xf32>
    %c0_13 = arith.constant 0 : index
    %c0_14 = arith.constant 0 : index
    %25 = vector.load %arg11[%c0_13, %c0_14] : memref<8x1xf32, #tpu.memory_space<vmem>>, vector<8x1xf32>
    tpu.vector_store %arg11[%c0_13, %c0_14], %24 {strides = array<i32>} : memref<8x1xf32, #tpu.memory_space<vmem>>, vector<8x1xf32>,
    %cst_15 = arith.constant dense<0xFF800000> : vector<8xf32>
    %26 = vector.multi_reduction <maximumf>, %18, %cst_15 [1] : vector<8x128xf32> to vector<8xf32>
    %27 = vector.shape_cast %26 : vector<8xf32> to vector<8x1xf32>
    %c0_16 = arith.constant 0 : index
    %c0_17 = arith.constant 0 : index
    %28 = vector.load %arg9[%c0_16, %c0_17] : memref<8x1xf32, #tpu.memory_space<vmem>>, vector<8x1xf32>
    %29 = arith.maximumf %28, %27 : vector<8x1xf32>
    %c0_18 = arith.constant 0 : index
    %c0_19 = arith.constant 0 : index
    %30 = vector.load %arg10[%c0_18, %c0_19] : memref<8x1xf32, #tpu.memory_space<vmem>>, vector<8x1xf32>
    %c0_20 = arith.constant 0 : index
    %c0_21 = arith.constant 0 : index
    %31 = vector.load %arg9[%c0_20, %c0_21] : memref<8x1xf32, #tpu.memory_space<vmem>>, vector<8x1xf32>
    %32 = arith.subf %31, %29 : vector<8x1xf32>
    %33 = math.exp %32 : vector<8x1xf32>
    %34 = arith.mulf %30, %33 : vector<8x1xf32>
    %35 = vector.broadcast %29 : vector<8x1xf32> to vector<8x128xf32>
    %36 = arith.subf %18, %35 : vector<8x128xf32>
    %37 = math.exp %36 : vector<8x128xf32>
    %cst_22 = arith.constant dense<0.000000e+00> : vector<8xf32>
    %38 = vector.multi_reduction <add>, %37, %cst_22 [1] : vector<8x128xf32> to vector<8xf32>
    %39 = vector.shape_cast %38 : vector<8xf32> to vector<8x1xf32>
    %40 = arith.addf %34, %39 : vector<8x1xf32>
    %c0_23 = arith.constant 0 : index
    %c0_24 = arith.constant 0 : index
    %41 = vector.load %arg10[%c0_23, %c0_24] : memref<8x1xf32, #tpu.memory_space<vmem>>, vector<8x1xf32>
    tpu.vector_store %arg10[%c0_23, %c0_24], %40 {strides = array<i32>} : memref<8x1xf32, #tpu.memory_space<vmem>>, vector<8x1xf32>,
    %c0_25 = arith.constant 0 : index
    %c0_26 = arith.constant 0 : index
    %42 = vector.load %arg9[%c0_25, %c0_26] : memref<8x1xf32, #tpu.memory_space<vmem>>, vector<8x1xf32>
    tpu.vector_store %arg9[%c0_25, %c0_26], %29 {strides = array<i32>} : memref<8x1xf32, #tpu.memory_space<vmem>>, vector<8x1xf32>,
    %43 = vector.broadcast %27 : vector<8x1xf32> to vector<8x128xf32>
    %44 = arith.cmpf oge, %18, %43 : vector<8x128xf32>
    %c512_i32 = arith.constant 512 : i32
    %45 = vector.broadcast %c512_i32 : i32 to vector<8x128xi32>
    %46 = arith.select %44, %13, %45 : vector<8x128xi1>, vector<8x128xi32>
    %cst_27 = arith.constant dense<2147483647> : vector<8xi32>
    %47 = vector.multi_reduction <minsi>, %46, %cst_27 [1] : vector<8x128xi32> to vector<8xi32>
    %48 = vector.shape_cast %47 : vector<8xi32> to vector<8x1xi32>
    %c0_28 = arith.constant 0 : index
    %c0_29 = arith.constant 0 : index
    %49 = vector.load %arg12[%c0_28, %c0_29] : memref<8x1xf32, #tpu.memory_space<vmem>>, vector<8x1xf32>
    %50 = arith.cmpf ogt, %27, %49 : vector<8x1xf32>
    %c0_30 = arith.constant 0 : index
    %c0_31 = arith.constant 0 : index
    %51 = vector.load %arg12[%c0_30, %c0_31] : memref<8x1xf32, #tpu.memory_space<vmem>>, vector<8x1xf32>
    %52 = arith.select %50, %27, %51 : vector<8x1xi1>, vector<8x1xf32>
    %c0_32 = arith.constant 0 : index
    %c0_33 = arith.constant 0 : index
    %53 = vector.load %arg12[%c0_32, %c0_33] : memref<8x1xf32, #tpu.memory_space<vmem>>, vector<8x1xf32>
    tpu.vector_store %arg12[%c0_32, %c0_33], %52 {strides = array<i32>} : memref<8x1xf32, #tpu.memory_space<vmem>>, vector<8x1xf32>,
    %c0_34 = arith.constant 0 : index
    %c0_35 = arith.constant 0 : index
    %54 = vector.load %arg13[%c0_34, %c0_35] : memref<8x1xi32, #tpu.memory_space<vmem>>, vector<8x1xi32>
    %55 = arith.select %50, %48, %54 : vector<8x1xi1>, vector<8x1xi32>
    %c0_36 = arith.constant 0 : index
    %c0_37 = arith.constant 0 : index
    %56 = vector.load %arg13[%c0_36, %c0_37] : memref<8x1xi32, #tpu.memory_space<vmem>>, vector<8x1xi32>
    tpu.vector_store %arg13[%c0_36, %c0_37], %55 {strides = array<i32>} : memref<8x1xi32, #tpu.memory_space<vmem>>, vector<8x1xi32>,
    %c3_i32 = arith.constant 3 : i32
    %57 = arith.cmpi eq, %arg1, %c3_i32 : i32
    %58 = arith.extui %57 : i1 to i32
    %c0_i32_38 = arith.constant 0 : i32
    %59 = arith.cmpi ne, %58, %c0_i32_38 : i32
    scf.if %59 {
      %c0_39 = arith.constant 0 : index
      %c0_40 = arith.constant 0 : index
      %60 = vector.load %arg9[%c0_39, %c0_40] : memref<8x1xf32, #tpu.memory_space<vmem>>, vector<8x1xf32>
      %c0_41 = arith.constant 0 : index
      %c0_42 = arith.constant 0 : index
      %61 = vector.load %arg10[%c0_41, %c0_42] : memref<8x1xf32, #tpu.memory_space<vmem>>, vector<8x1xf32>
      %62 = math.log %61 : vector<8x1xf32>
      %63 = arith.addf %60, %62 : vector<8x1xf32>
      %c0_43 = arith.constant 0 : index
      %c0_44 = arith.constant 0 : index
      %64 = vector.load %arg11[%c0_43, %c0_44] : memref<8x1xf32, #tpu.memory_space<vmem>>, vector<8x1xf32>
      %65 = arith.subf %63, %64 : vector<8x1xf32>
      %c0_45 = arith.constant 0 : index
      %c0_46 = arith.constant 0 : index
      %66 = vector.load %arg6[%c0_45, %c0_46] : memref<8x1xf32, #tpu.memory_space<vmem>>, vector<8x1xf32>
      tpu.vector_store %arg6[%c0_45, %c0_46], %65 {strides = array<i32>} : memref<8x1xf32, #tpu.memory_space<vmem>>, vector<8x1xf32>,
      %c0_47 = arith.constant 0 : index
      %c0_48 = arith.constant 0 : index
      %67 = vector.load %arg13[%c0_47, %c0_48] : memref<8x1xi32, #tpu.memory_space<vmem>>, vector<8x1xi32>
      %68 = arith.cmpi eq, %67, %3 : vector<8x1xi32>
      %69 = arith.extui %68 : vector<8x1xi1> to vector<8x1xi32>
      %70 = arith.sitofp %69 : vector<8x1xi32> to vector<8x1xf32>
      %c0_49 = arith.constant 0 : index
      %c0_50 = arith.constant 0 : index
      %71 = vector.load %arg7[%c0_49, %c0_50] : memref<8x1xf32, #tpu.memory_space<vmem>>, vector<8x1xf32>
      tpu.vector_store %arg7[%c0_49, %c0_50], %70 {strides = array<i32>} : memref<8x1xf32, #tpu.memory_space<vmem>>, vector<8x1xf32>,
    } else {
    }
    return
  }
  func.func @transform_0(%arg0: i32, %arg1: i32) -> (i32, i32) {
    %c0_i32 = arith.constant 0 : i32
    %c0_i32_0 = arith.constant 0 : i32
    return %arg0, %c0_i32 : i32, i32
  }
  func.func @transform_1(%arg0: i32, %arg1: i32) -> (i32, i32) {
    %c0_i32 = arith.constant 0 : i32
    %c0_i32_0 = arith.constant 0 : i32
    return %c0_i32, %arg1 : i32, i32
  }
  func.func @transform_2(%arg0: i32, %arg1: i32) -> (i32, i32) {
    %c0_i32 = arith.constant 0 : i32
    %c0_i32_0 = arith.constant 0 : i32
    return %c0_i32, %arg1 : i32, i32
  }
  func.func @transform_3(%arg0: i32, %arg1: i32) -> (i32, i32) {
    %c0_i32 = arith.constant 0 : i32
    %c0_i32_0 = arith.constant 0 : i32
    return %arg0, %c0_i32 : i32, i32
  }
  func.func @transform_4(%arg0: i32, %arg1: i32) -> (i32, i32) {
    %c0_i32 = arith.constant 0 : i32
    %c0_i32_0 = arith.constant 0 : i32
    return %arg0, %c0_i32 : i32, i32
  }
  func.func @transform_5(%arg0: i32, %arg1: i32) -> (i32, i32) {
    %c0_i32 = arith.constant 0 : i32
    %c0_i32_0 = arith.constant 0 : i32
    return %arg0, %c0_i32 : i32, i32
  }
}

</mosaic_0001>

<bundles_post_ra>
// kernel: tpu_custom_call.1
= control target key start
LH: loop header
LB: loop body
LE: loop exit
PB: predicated region body
PF: predicated region fallthrough
CT: control target
= control target key end

     0   :  { %s1099_s0 = inlined_call_operand.vmem [shape: f32[16,64], index: 0, kind: input, shape index: {}]   ;;  %s1100_s1 = inlined_call_operand.hbm [shape: bf16[64,512], index: 1, kind: input, shape index: {}]   ;;  %s1101_s2 = inlined_call_operand.vmem [shape: f32[1,512], index: 2, kind: input, shape index: {}]   ;;  %s1102_s3 = inlined_call_operand.vmem [shape: s32[16,1], index: 3, kind: input, shape index: {}]   ;;  %s1103_s4 = inlined_call_operand.vmem [shape: f32[16,1], index: 4, kind: output, shape index: {0}]   ;;  %s1104_s5 = inlined_call_operand.vmem [shape: f32[16,1], index: 5, kind: output, shape index: {1}]  }
   0x1   :  { %1105 = sst [smem:[#allocation11_spill]] %s1100_s1 }
   0x2   :  { %11 = vsyncpa [#allocation9], 0 }
   0x3   :  { %13 = vsyncpa [#allocation9 + $0x1], 0  ;;  %s916_s18 = smov 0   ;;  %s918_s19 = smov 0  }
   0x4   :  { %s920_s20 = smov 0   ;;  %s922_s21 = smov 0  }
   0x5   :  { %s924_s22 = smov 0   ;;  %s926_s23 = smov 0  }
   0x6   :  { %s928_s24 = smov 0   ;;  %s930_s25 = smov 0  }
   0x7 LB: > { %s642_s26 = sadd.s32 4294967295, %s873_s25   ;;  %s28_s27 = sadd.s32 1, %s865_s23  ;;  %s873_s25 = sphi %s930_s25, %s19_s25   ;;  %s869_s24 = sphi %s928_s24, %s1116_s24   ;;  %s865_s23 = sphi %s926_s23, %s1115_s23   ;;  %s861_s22 = sphi %s924_s22, %s1114_s22   ;;  %s857_s21 = sphi %s922_s21, %s1113_s21   ;;  %s853_s20 = sphi %s920_s20, %s1112_s20   ;;  %s849_s19 = sphi %s918_s19, %s1111_s19   ;;  %s845_s18 = sphi %s916_s18, %s1110_s18  }
   0x8   : > { %p29_p0 = scmp.ge.s32.totalorder %s28_s27, 4  ;;  %s31_s28 = sadd.s32 1, %s869_s24 }
   0x9   : > { %s64_s29 = sadd.s32 1, %s853_s20  ;;  %p71_p1 = scmp.ne.s32.totalorder %s853_s20, %s849_s19 }
   0xa   : > { %s1118_s27 = smov (%p29_p0, %s28_s27), 0  ;;  %s1120_s28 = smov (!%p29_p0, %s31_s28), %s869_s24 }
   0xb   : > { %s61_s30 = ssub.s32 %s865_s23, %s1118_s27  ;;  %p72_p2 = scmp.eq.s32.totalorder %s873_s25, 0 }
   0xc   : > { %p33_p3 = scmp.ge.s32.totalorder %s1120_s28, 2  ;;  %p62_p4 = scmp.eq.s32.totalorder %s61_s30, 0 }
   0xd   : > { %p966_p5 = por %p72_p2, %p71_p1  ;;  %p77_p6 = scmp.ne.s32.totalorder %s849_s19, %s845_s18 }
   0xe   : > { %s1122_s28 = smov (%p33_p3, %s1120_s28), 0  ;;  %p78_p7 = scmp.eq.s32.totalorder %s642_s26, 0 }
   0xf   : > { %s974_s7 = scalar_select %p62_p4, %s853_s20, %s64_s29  }
  0x10   : > { %p690_p8 = scmp.lt.s32.totalorder %s873_s25, 8  ;;  %s212_s8 = sand.u32 1, %s853_s20  }
  0x11   : > { %p978_p9 = por %p78_p7, %p77_p6  ;;  %s646_s10 = sshll.u32 %s212_s8, 5 }
  0x12   : > { %s647_s11 = sshll.u32 %s865_s23, 6  ;;  %s1108_s1 = sld [smem:[#allocation11_spill]] }
  0x13   : > { %s216_s15 = scalar_lea.vmem [#allocation8], %s646_s10  ;;  %p988_p10 = pnand %p690_p8, %p966_p5 }
  0x14   : > { %s222_s16 = sshll.u32 %s216_s15, 4  ;;  %p648_p11 = scmp.ge.s32.totalorder %s873_s25, 1  ;;  %s223_s16 = int_to_ptr.vmem [resolvable:$true] %s222_s16 }
  0x15   : > { %s213_s18 = scalar_lea.sflag [#allocation9], %s212_s8  ;;  %p781_p12 = pneg %p988_p10 }
  0x16   : > { %s792_s26 = scalar_lea.vmem %s223_s16, 512  ;;  %s875_s29 = smov [#allocation8]  }
  0x17   : > { %p793_p13 = scmp.ne.s32.totalorder %s223_s16, %s792_s26  ;;  %s797_s30 = sshll.u32 %s875_s29, 4  ;;  %s798_s30 = int_to_ptr.vmem [resolvable:$false] %s797_s30 }
  0x18   : > { %s221_s14 = scalar_lea.hbm %s1108_s1, %s647_s11  ;;  %s799_s10 = scalar_lea.vmem %s798_s30, 1024 }
  0x19   : > { %p795_p0 = pnand %p793_p13, %p781_p12  ;;  %p800_p2 = scmp.lt.s32.totalorder %s223_s16, %s798_s30 }
  0x1a   : > { %p801_p3 = scmp.lt.s32.totalorder %s799_s10, %s792_s26 }
  0x1b   : > { %p796_p1 = pneg %p795_p0 }
  0x1c   : > { %p802_p4 = por %p801_p3, %p800_p2 }
  0x1e   : > { %p803_p5 = pnand %p802_p4, %p796_p1 }
  0x20   : > { %806 = shalt.err (!%p803_p5)
}
  0x21   : > { %s876_s6 = smov 256   ;;  %s877_s8 = smov 64  }
  0x22   : > { %s878_s11 = smov 4   ;;  %p243_p6 = scmp.lt.s32.totalorder %s873_s25, 9 }
  0x23   : > { %689 = dma.hbm_to_vmem [thread:$0]  (!%p988_p10), %s221_s14, 512, %s223_s16, %s213_s18, %s876_s6, %s877_s8, %s878_s11  }
  0x24   : > { %p244_p7 = pnand %p648_p11, %p243_p6 }
  0x25   : > { %s249_s12 = sand.u32 (!%p244_p7), 1, %s849_s19  }
  0x26   : > { %247 = sbr.rel (%p244_p7) target bundleno = 914 (0x392), region = 36  ;;  %s649_s13 = sshll.u32 (!%p244_p7), %s249_s12, 5 }
  0x27   : > { %s250_s15 = scalar_lea.sflag (!%p244_p7), [#allocation9], %s249_s12  ;;  %s1001_s26 = scalar_lea.vmem (!%p244_p7), [#allocation8], %s649_s13 }
  0x2b   : > { %840 = dma.done.wait (%p978_p9), %s250_s15, 512  }
  0x2c   : > { %842 = vsyncadd (%p978_p9), %s250_s15, 4294966784  ;;  %p294_p8 = scmp.lt.s32.totalorder %s861_s22, 1  ;;  %p298_p10 = scmp.lt.s32.totalorder %s857_s21, 3 }
  0x2d   : > { %p654_p9 = scmp.ne.s32.totalorder %s857_s21, 0 }
  0x2e   : > { %s1124_s22 = smov (!%p294_p8, %s861_s22), 1 }
  0x2f   : > { %s1011_s14 = scalar_select %p298_p10, %s857_s21, 3 }
  0x30   : > { %s1013_s16 = sshll.u32 %s1124_s22, 3  ;;  %317 = sbr.rel (%p654_p9) target bundleno = 216 (0xd8), region = 44 }
  0x31   : > { %s297_s9 = scalar_lea.vmem %s1099_s0, %s1013_s16  ;;  %s300_s10 = scalar_lea.vmem %s1101_s2, %s1011_s14 }
  0x32   : > { %s304_s11 = scalar_lea.vmem %s1102_s3, %s1013_s16  ;;  %s308_s22 = scalar_lea.vmem %s1103_s4, %s1013_s16 }
  0x33   : > { %s312_s17 = scalar_lea.vmem %s1104_s5, %s1013_s16 }
  0x35   : > { %v318_v0 = vld [vmem:[%s297_s9] sm:$0xff]  ;;  %vm320_vm0 = vcmask 523264   ;;  %vm330_vm1 = vcmask 7168   ;;  %v879_v3 = vmov -inf   ;;  %v880_v4 = vmov 0.0  }
  0x36   : > { %v319_v1 = vmul.f32 %v318_v0, %v318_v0  ;;  %331 = vst.msk [vmem:[#allocation3] sm:$0xff] %vm330_vm1, %v879_v3  ;;  %332 = vst.msk [vmem:[#allocation4] sm:$0xff] %vm330_vm1, %v880_v4  ;;  %v881_v5 = vmov 0   ;;  %vm328_vm2 = vcmask 519168  }
  0x37   : > { %333 = vst.msk [vmem:[#allocation5] sm:$0xff] %vm330_vm1, %v880_v4  ;;  %334 = vst.msk [vmem:[#allocation6] sm:$0xff] %vm330_vm1, %v879_v3 }
  0x38   : > { %v321_v2 = vsel %vm320_vm0, %v319_v1, 0.0  ;;  %335 = vst.msk [vmem:[#allocation7] sm:$0xff] %vm330_vm1, %v881_v5 }
  0x39   : > { %322 = vadd.xlane.f32.xlu0 %v321_v2 }
  0xc2   : > { %v323_v6 = vpop.xlane.xlu0 %322 }
  0xc3   : > { %v324_v7 = vmax.f32 %v323_v6, 1e-24 }
  0xc5   : > { %765 = vrsqrt.f32 %v324_v7 }
  0xd2   : > { %v766_v8 = vpop.eup %765 }
  0xd3   : > { %v326_v9 = vmul.f32 %v766_v8, %v318_v0 }
  0xd5   : > { %v327_v10 = vpack.c.bf16 %v326_v9, %v326_v9 }
  0xd7   : > { %329 = vst.msk [vmem:[#allocation2] sm:$0xf] %vm328_vm2, %v327_v10 }
  0xd8 PF: > { %v769_v11 = vld [vmem:[%s1001_s26 + $0x18] sm:$0xff]   ;;  %v882_v12 = vmov 0.0   ;;  %v770_v13 = vld [vmem:[%s1001_s26 + $0x10] sm:$0xff]   ;;  %vm883_vm3 = vmmov 0   ;;  %v884_v14 = vmov 0   ;;  %v771_v16 = vld [vmem:[%s1001_s26 + $0x8] sm:$0xff]   ;;  %v422_v19 = vlaneseq }
  0xd9   : > { %672 = vmatprep.subr.bf16.mxu0 %v882_v12  ;;  %680 = vmatprep.mubr.msk.bf16.mxu0 %vm883_vm3, %v882_v12  ;;  %v1043_v15 = vld [vmem:[%s304_s11] sm:$0xff]  ;;  %v772_v17 = vld [vmem:[%s1001_s26] sm:$0xff]   ;;  %vm370_vm4 = vcmask 523264   ;;  %s661_s9 = sshll.u32 %s857_s21, 7  ;;  %vm438_vm6 = vcmask 7168   ;;  %v433_v61 = vld [vmem:[#allocation5] sm:$0xff] }
  0xda   : > { %673 = vmatpush3.bf16.msra.mxu0 %v769_v11  ;;  %767 = vset.pattern.permute.xlu0 %v884_v14  ;;  %v423_v20 = vand.u32 127, %v422_v19  ;;  %v425_v21 = vstv %s661_s9  ;;  %v660_v22 = vld [vmem:[%s300_s10] ss:$0 sm:$0xff]  ;;  %v442_v34 = vld [vmem:[#allocation3] sm:$0xff]  ;;  %v444_v52 = vld [vmem:[#allocation4] sm:$0xff]  ;;  %p663_p11 = scmp.ne.s32.totalorder %s857_s21, 3 }
  0xdb   : > { %674 = vmatprep.subr.bf16.mxu0 %v882_v12  ;;  %768 = vset.pattern.permute.xlu1 %v884_v14  ;;  %v478_v33 = vld [vmem:[#allocation6] sm:$0xff]  ;;  %v482_v60 = vld [vmem:[#allocation7] sm:$0xff] }
  0xdc   : > { %428 = vperm.xlu0 %767, %v1043_v15   ;;  %v426_v23 = vadd.s32 %v425_v21, %v423_v20 }
  0xde   : > { %675 = vmatpush3.bf16.msra.mxu0 %v770_v13  ;;  %v337_v18 = vld [vmem:[#allocation2] sm:$0xf] }
  0xdf   : > { %676 = vmatprep.subr.bf16.mxu0 %v882_v12 }
  0xe2   : > { %677 = vmatpush3.bf16.msra.mxu0 %v771_v16 }
  0xe3   : > { %678 = vmatprep.subr.bf16.mxu0 %v882_v12 }
  0xe6   : > { %679 = vmatpush3.bf16.msra.mxu0 %v772_v17 }
  0xe9   : > { %681 = vmatmul.mubr.msk.bf16.vlgmr.msra.gmra.mxu0 %vm370_vm4, %v337_v18 }
 0x157   : > { %v429_v24 = vpop.permute.xlu0 %428 }
 0x158   : > { %vm430_vm5 = vcmp.eq.s32.totalorder %v426_v23, %v429_v24 }
 0x1a9   : > { %v408_v25 = vpop.f32.mrf.mxu0 }
 0x1aa   : > { %v421_v26 = vmul.f32 %v660_v22, %v408_v25 }
 0x1ab   : > { %v682_v27 = vpop.f32.mrf.mxu0 }
 0x1ac   : > { %v662_v28 = vadd.f32 -6.0, %v421_v26 }
 0x1ad   : > { %v411_v29 = vpop.f32.mrf.mxu0 }
 0x1ae   : > { %v432_v30 = vsel %vm430_vm5, %v662_v28, %v421_v26  ;;  %v434_v31 = vsel %vm430_vm5, %v662_v28, 0.0 }
 0x1af   : > { %v683_v32 = vpop.f32.mrf.mxu0  ;;  %440 = vmax.xlane.f32.xlu0 %v432_v30 }
 0x238   : > { %v441_v35 = vpop.xlane.xlu0 %440 }
 0x239   : > { %vm479_vm7 = vcmp.gt.f32.partialorder %v441_v35, %v478_v33  ;;  %v443_v36 = vmax.f32 %v442_v34, %v441_v35  ;;  %vm462_vm8 = vcmp.ge.f32.partialorder %v432_v30, %v441_v35 }
 0x23a   : > { %v480_v37 = vsel %vm479_vm7, %v441_v35, %v478_v33  ;;  %v463_v39 = vsel %vm462_vm8, %v426_v23, 512 }
 0x23b   : > { %481 = vst.msk [vmem:[#allocation6] sm:$0xff] %vm438_vm6, %v480_v37  ;;  %451 = vperm.xlu1 %768, %v443_v36   ;;  %v445_v38 = vsub.f32 %v442_v34, %v443_v36  ;;  %461 = vst.msk [vmem:[#allocation3] sm:$0xff] %vm438_vm6, %v443_v36  ;;  %v465_v40 = vshra.s32 %v463_v39, 16  ;;  %v464_v46 = vand.u32 65535, %v463_v39 }
 0x23d   : > { %v467_v41 = vcvt.s32.f32 %v465_v40  ;;  %v466_v48 = vcvt.s32.f32 %v464_v46  ;;  %v446_v50 = vmul.f32 1.442695, %v445_v38 }
 0x25f   : > { %468 = vmin.xlane.f32.xlu1 %v467_v41 }
 0x2b6   : > { %v452_v42 = vpop.permute.xlu1 %451 }
 0x2b7   : > { %v454_v43 = vsub.f32 %v432_v30, %v452_v42 }
 0x2b9   : > { %v455_v44 = vmul.f32 1.442695, %v454_v43 }
 0x2bb   : > { %773 = vpow2.f32 %v455_v44 }
 0x2bc   : > { %775 = vpow2.f32 %v446_v50 }
 0x2c8   : > { %v774_v45 = vpop.eup %773 }
 0x2c9   : > { %457 = vadd.xlane.f32.xlu1 %v774_v45  ;;  %v776_v51 = vpop.eup %775 }
 0x2ca   : > { %v448_v53 = vmul.f32 %v776_v51, %v444_v52 }
 0x2e8   : > { %v469_v47 = vpop.xlane.xlu1 %468 }
 0x2e9   : > { %vm470_vm9 = vcmp.eq.f32.partialorder %v467_v41, %v469_v47  ;;  %v475_v56 = vcvt.f32.s32 %v469_v47 }
 0x2ea   : > { %v471_v49 = vsel %vm470_vm9, %v466_v48, inf }
 0x2eb   : > { %472 = vmin.xlane.f32.xlu0 %v471_v49  ;;  %v476_v58 = vshll.u32 %v475_v56, 16 }
 0x2ef   : > { %435 = vadd.xlane.f32.xlu0 %v434_v31 }
 0x352   : > { %v458_v54 = vpop.xlane.xlu1 %457 }
 0x353   : > { %v459_v55 = vadd.f32 %v458_v54, %v448_v53 }
 0x355   : > { %460 = vst.msk [vmem:[#allocation4] sm:$0xff] %vm438_vm6, %v459_v55 }
 0x374   : > { %v473_v57 = vpop.xlane.xlu0 %472 }
 0x375   : > { %v474_v59 = vcvt.f32.s32 %v473_v57 }
 0x377   : > { %v477_v62 = vadd.s32 %v476_v58, %v474_v59  ;;  %488 = sbr.rel (%p663_p11) target bundleno = 914 (0x392), region = 48 }
 0x378   : > { %v436_v63 = vpop.xlane.xlu0 %435 }
 0x379   : > { %v483_v0 = vsel %vm479_vm7, %v477_v62, %v482_v60  ;;  %v437_v1 = vadd.f32 %v436_v63, %v433_v61 }
 0x37a   : > { %484 = vst.msk [vmem:[#allocation7] sm:$0xff] %vm438_vm6, %v483_v0 }
 0x37b   : > { %439 = vst.msk [vmem:[#allocation5] sm:$0xff] %vm438_vm6, %v437_v1 }
 0x37c   : > { %v490_v2 = vld [vmem:[#allocation4] sm:$0xff]  ;;  %v885_v4 = vmov 0.0   ;;  %v489_v7 = vld [vmem:[#allocation3] sm:$0xff] }
 0x37d   : > { %777 = vlog2.f32 %v490_v2 }
 0x381   : > { %v497_v3 = vld [vmem:[#allocation7] sm:$0xff] }
 0x382   : > { %vm498_vm10 = vcmp.eq.s32.totalorder %v497_v3, %v1043_v15  ;;  %v494_v9 = vld [vmem:[#allocation5] sm:$0xff] }
 0x383   : > { %v664_v5 = vsel %vm498_vm10, 1.0, %v885_v4 }
 0x384   : > { %501 = vst.msk [vmem:[%s312_s17] sm:$0xff] %vm438_vm6, %v664_v5 }
 0x38a   : > { %v778_v6 = vpop.eup %777 }
 0x38b   : > { %v492_v8 = vmul.f32 0.6931472, %v778_v6 }
 0x38d   : > { %v493_v10 = vadd.f32 %v492_v8, %v489_v7 }
 0x38f   : > { %v495_v11 = vsub.f32 %v493_v10, %v494_v9 }
 0x391   : > { %496 = vst.msk [vmem:[%s308_s22] sm:$0xff] %vm438_vm6, %v495_v11 }
 0x392 PF: > { %s19_s25 = sadd.s32 1, %s873_s25   ;;  %s1110_s18 = smov %s849_s19 }
 0x393   : > { %p16_p12 = scmp.ge.s32.totalorder %s19_s25, 10   ;;  %s1111_s19 = smov %s853_s20 }
 0x394   : > { %s1112_s20 = smov %s974_s7  ;;  %s1113_s21 = smov %s865_s23 }
 0x395   : > { %s1114_s22 = smov %s869_s24  ;;  %s1115_s23 = smov %s1118_s27 }
 0x396   : > { %s1116_s24 = smov %s1122_s28  ;;  %18 = sbr.rel (!%p16_p12) target bundleno = 7 (0x7), region = 105 }
 0x39b   :  { %535 = vsyncpa [#allocation9], 1 }
 0x39c   :  { %537 = vsyncpa [#allocation9 + $0x1], 1 }

</bundles_post_ra>
